<compile_context>
chip_gen: v6e
topology: v6e:2x2x1
jax: 0.10.0
libtpu: 0.0.40
codegen_flags: <defaults>
</compile_context>

<pallas_src>
import math

import jax
import jax.numpy as jnp
from jax.experimental import pallas as pl
from jax.experimental.pallas import tpu as pltpu

# ---- model hyper-params (small, consistent with the module) ----------------
HIDDEN = 32                 # config.hidden_size
NUM_HEADS = 4               # config.num_attention_heads
HEAD_DIM = HIDDEN // NUM_HEADS
ALL_HEAD = NUM_HEADS * HEAD_DIM
NUM_SENSES = 4              # tok_sense_embeds.shape[-2]
SH = NUM_SENSES * HIDDEN    # 128 : lane-dense flattened sense width
QW = NUM_HEADS * SH         # 512 : sense-replicated fused query->key weight width
TEMPERATURE = 1.0
INIT_RANGE = 0.02           # config.initializer_range


def _round_up(x, m):
    return (x + m - 1) // m * m


def _tpu_defaults():
    """(block_rows, vmem_limit_bytes) tuned per TPU generation."""
    kind = ""
    try:
        kind = jax.devices()[0].device_kind.lower()
    except Exception:
        pass
    if "v5" in kind:
        return 1024, 32 * 1024 * 1024
    if "v7" in kind or "7x" in kind:
        return 4096, 48 * 1024 * 1024      # 64 MiB VMEM per TC -> keep headroom
    return 2048, 64 * 1024 * 1024          # v6e / unknown


def sdu_kernel(tok_ref, sense_ref, wall_ref, ball_ref, wqb_ref, bqb_ref, g_ref,
               se_ref, sw_ref):
    # tok_ref   : (TB, H)       flattened token reps
    # sense_ref : (TB, S*H)     lane-dense flattened sense embeddings
    # wall_ref  : (H, NH*S*H)   fused, scaled, sense-replicated query->key weight
    # ball_ref  : (1, NH*S*H)   fused bias (bq routed through Wk), sense-replicated
    # wqb_ref   : (H, NH)       fused, scaled query->key-bias weight
    # bqb_ref   : (1, NH)       fused constant (bq . bk_h) * scale
    # g_ref     : (S*H, S)      group-sum constant: g[l, s] = 1 iff l // H == s
    # se_ref    : (TB, H)       output sense-weighted embedding
    # sw_ref    : (TB, S)       output sense weights
    tok = tok_ref[...].astype(jnp.float32)
    sense = sense_ref[...].astype(jnp.float32)

    # qw_all[b, h*S*H + s*H + d] = scale * (q_h[b] @ Wk_h)[d]   (one MXU pass)
    qw_all = jnp.dot(tok, wall_ref[...],
                     preferred_element_type=jnp.float32) + ball_ref[...]
    # qb[b, h] = scale * q_h[b] . bk_h
    qb = jnp.dot(tok, wqb_ref[...],
                 preferred_element_type=jnp.float32) + bqb_ref[...]

    g = g_ref[...]

    pooled = None
    for h in range(NUM_HEADS):
        # vreg-aligned 128-lane slice; no replication / concatenation needed
        prod = sense * qw_all[:, h * SH:(h + 1) * SH]            # (TB, S*H)
        # scores_h[b, s] = sum_d prod[b, s*H + d]   (MXU group-sum reduce)
        scores_h = jnp.dot(prod, g,
                           preferred_element_type=jnp.float32) + qb[:, h:h + 1]
        # per-head softmax over senses
        m = jnp.max(scores_h, axis=-1, keepdims=True)
        e = jnp.exp(scores_h - m)
        p = e / jnp.sum(e, axis=-1, keepdims=True)
        pooled = p if pooled is None else jnp.maximum(pooled, p)

    # final softmax over senses of head-pooled probabilities
    z = pooled / TEMPERATURE
    z = z - jnp.max(z, axis=-1, keepdims=True)
    ez = jnp.exp(z)
    sw = ez / jnp.sum(ez, axis=-1, keepdims=True)                # (TB, S)

    # se[b,:] = sum_s sw[b,s] * sense[b, s*H:(s+1)*H]  -- 4 VPU FMAs
    se = sw[:, 0:1] * sense[:, 0:HIDDEN]
    for s in range(1, NUM_SENSES):
        se = se + sw[:, s:s + 1] * sense[:, s * HIDDEN:(s + 1) * HIDDEN]

    se_ref[...] = se.astype(se_ref.dtype)
    sw_ref[...] = sw.astype(sw_ref.dtype)


def prepare_params(wq, bq, wk, bk):
    """Torch-layout params (AH,H)/(AH,) -> fused kernel layouts (host-side)."""
    hp = jax.lax.Precision.HIGHEST
    scale = 1.0 / math.sqrt(HEAD_DIM)

    wq_t = wq.astype(jnp.float32).T                              # (H, AH)
    bq_f = bq.astype(jnp.float32)[None, :]                       # (1, AH)

    head_of_row = jnp.arange(ALL_HEAD) // HEAD_DIM               # (AH,)
    mask = (head_of_row[:, None] == jnp.arange(NUM_HEADS)[None, :]).astype(jnp.float32)
    # wk_blk[a, h*H + d] = wk[a, d] if row a belongs to head h else 0
    wk_blk = (wk.astype(jnp.float32)[:, None, :] * mask[:, :, None]
              ).reshape(ALL_HEAD, NUM_HEADS * HIDDEN)            # (AH, NH*H)
    bk_head = bk.astype(jnp.float32)[:, None] * mask             # (AH, NH)

    # fold query projection + scale into key-side weights
    w_fused = jnp.dot(wq_t, wk_blk, precision=hp) * scale        # (H, NH*H)
    b_fused = jnp.dot(bq_f, wk_blk, precision=hp) * scale        # (1, NH*H)
    wqb = jnp.dot(wq_t, bk_head, precision=hp) * scale           # (H, NH)
    bqb = jnp.dot(bq_f, bk_head, precision=hp) * scale           # (1, NH)

    # bake sense replication into the fused weight/bias:
    # col index = h*S*H + s*H + d  <-  w_fused[:, h*H + d]
    w_all = jnp.tile(w_fused.reshape(HIDDEN, NUM_HEADS, 1, HIDDEN),
                     (1, 1, NUM_SENSES, 1)).reshape(HIDDEN, QW)  # (H, NH*S*H)
    b_all = jnp.tile(b_fused.reshape(1, NUM_HEADS, 1, HIDDEN),
                     (1, 1, NUM_SENSES, 1)).reshape(1, QW)       # (1, NH*S*H)

    # group-sum constant
    g = (jnp.arange(SH)[:, None] // HIDDEN
         == jnp.arange(NUM_SENSES)[None, :]).astype(jnp.float32)  # (S*H, S)
    return w_all, b_all, wqb, bqb, g


def sense_disambiguation(tok_reps, tok_sense_embeds, wq, bq, wk, bk,
                         *, block_rows=None, vmem_limit_bytes=None):
    bs, seq, H = tok_reps.shape
    S = tok_sense_embeds.shape[-2]
    assert H == HIDDEN and S == NUM_SENSES

    def_rows, def_vmem = _tpu_defaults()
    if block_rows is None:
        block_rows = def_rows
    if vmem_limit_bytes is None:
        vmem_limit_bytes = def_vmem
    assert block_rows % 8 == 0

    Bp = bs * seq
    tb = min(block_rows, _round_up(Bp, 8))
    grid = (pl.cdiv(Bp, tb),)   # ragged last block clipped by Pallas; no jnp.pad

    tok_flat = tok_reps.reshape(Bp, H)                     # native dtype, no copy
    sense_lane = tok_sense_embeds.reshape(Bp, S * H)       # lane-dense

    w_all, b_all, wqb, bqb, g = prepare_params(wq, bq, wk, bk)

    out_dtype = tok_reps.dtype
    se, sw = pl.pallas_call(
        sdu_kernel,
        out_shape=(jax.ShapeDtypeStruct((Bp, H), out_dtype),
                   jax.ShapeDtypeStruct((Bp, S), out_dtype)),
        grid_spec=pltpu.PrefetchScalarGridSpec(
            num_scalar_prefetch=0,
            grid=grid,
            in_specs=[
                pl.BlockSpec((tb, H), lambda i: (i, 0)),
                pl.BlockSpec((tb, S * H), lambda i: (i, 0)),
                pl.BlockSpec((H, QW), lambda i: (0, 0)),
                pl.BlockSpec((1, QW), lambda i: (0, 0)),
                pl.BlockSpec((H, NUM_HEADS), lambda i: (0, 0)),
                pl.BlockSpec((1, NUM_HEADS), lambda i: (0, 0)),
                pl.BlockSpec((S * H, S), lambda i: (0, 0)),
            ],
            out_specs=[
                pl.BlockSpec((tb, H), lambda i: (i, 0)),
                pl.BlockSpec((tb, S), lambda i: (i, 0)),
            ],
        ),
        compiler_params=pltpu.CompilerParams(
            dimension_semantics=("parallel",),
            vmem_limit_bytes=vmem_limit_bytes,
        ),
    )(tok_flat, sense_lane, w_all, b_all, wqb, bqb, g)

    se = se.reshape(bs, seq, H)
    sense_weights = sw.reshape(Bp, 1, S)   # torch sense_weights shape (B', 1, S)
    return se, sense_weights


def reference(tok_reps, tok_sense_embeds, wq, bq, wk, bk):
    """Pure-JAX mirror of the PyTorch forward pass (torch-layout params)."""
    bs, seq, H = tok_reps.shape
    S = tok_sense_embeds.shape[-2]
    tok = tok_reps.reshape(-1, H)
    sense = tok_sense_embeds.reshape(-1, S, H)
    q = tok @ wq.T + bq                                           # (B', AH)
    k = jnp.einsum('bsh,ah->bsa', sense, wk) + bk                 # (B', S, AH)
    qh = q.reshape(-1, NUM_HEADS, HEAD_DIM)
    kh = k.reshape(-1, S, NUM_HEADS, HEAD_DIM)
    scores = jnp.einsum('bnd,bsnd->bns', qh, kh) / math.sqrt(HEAD_DIM)
    probs = jax.nn.softmax(scores, axis=-1)                       # (B', NH, S)
    pooled = probs.max(axis=1)                                    # (B', S)
    sw = jax.nn.softmax(pooled / TEMPERATURE, axis=-1)
    se = jnp.einsum('bs,bsh->bh', sw, sense).reshape(bs, seq, H)
    return se, sw.reshape(-1, 1, S)


if __name__ == "__main__":
    key = jax.random.PRNGKey(0)
    k1, k2, k3, k4, k5, k6 = jax.random.split(key, 6)

    # parameters (deterministic init mirroring _init_weights: N(0, 0.02), zero bias)
    wq = INIT_RANGE * jax.random.normal(k3, (ALL_HEAD, HIDDEN), jnp.float32)
    wk = INIT_RANGE * jax.random.normal(k4, (ALL_HEAD, HIDDEN), jnp.float32)
    bq = jnp.zeros((ALL_HEAD,), jnp.float32)
    bk = jnp.zeros((ALL_HEAD,), jnp.float32)

    # ---- case 1: small canonical shapes (bs=2, seq=8, hidden=32, senses=4) ----
    bs, seq = 2, 8
    tok_reps = jax.random.normal(k1, (bs, seq, HIDDEN), jnp.float32)
    tok_sense_embeds = jax.random.normal(k2, (bs, seq, NUM_SENSES, HIDDEN), jnp.float32)

    se, sw = sense_disambiguation(tok_reps, tok_sense_embeds, wq, bq, wk, bk)
    jax.block_until_ready(se)
    jax.block_until_ready(sw)
    se_ref, sw_ref = reference(tok_reps, tok_sense_embeds, wq, bq, wk, bk)
    assert jnp.allclose(se, se_ref, atol=1e-5, rtol=1e-5)
    assert jnp.allclose(sw, sw_ref, atol=1e-5, rtol=1e-5)

    # ---- case 2: non-multiple B' + multi-step grid (exercises ragged last block) ----
    bs2, seq2 = 3, 7
    tok2 = jax.random.normal(k5, (bs2, seq2, HIDDEN), jnp.float32)
    sense2 = jax.random.normal(k6, (bs2, seq2, NUM_SENSES, HIDDEN), jnp.float32)
    se2, sw2 = sense_disambiguation(tok2, sense2, wq, bq, wk, bk, block_rows=8)
    jax.block_until_ready(se2)
    se2_ref, sw2_ref = reference(tok2, sense2, wq, bq, wk, bk)
    assert jnp.allclose(se2, se2_ref, atol=1e-5, rtol=1e-5)
    assert jnp.allclose(sw2, sw2_ref, atol=1e-5, rtol=1e-5)

    # TODO(synk): attention/head masks, relative position embeddings and dropout
    # (prob=0.0 here) are outside this config path and not implemented.
    print("KERNEL_OK")
</pallas_src>

<mosaic_0001>
module attributes {stable_mosaic.version = 11 : i64} {
  func.func @sdu_kernel(%arg0: i32, %arg1: memref<16x32xf32, #tpu.memory_space<vmem>>, %arg2: memref<16x128xf32, #tpu.memory_space<vmem>>, %arg3: memref<32x512xf32, #tpu.memory_space<vmem>>, %arg4: memref<1x512xf32, #tpu.memory_space<vmem>>, %arg5: memref<32x4xf32, #tpu.memory_space<vmem>>, %arg6: memref<1x4xf32, #tpu.memory_space<vmem>>, %arg7: memref<128x4xf32, #tpu.memory_space<vmem>>, %arg8: memref<16x32xf32, #tpu.memory_space<vmem>>, %arg9: memref<16x4xf32, #tpu.memory_space<vmem>>) attributes {dimension_semantics = [#tpu.dimension_semantics<parallel>], iteration_bounds = array<i64: 1>, scalar_prefetch = 0 : i64, scratch_operands = 0 : i64, tpu.core_type = #tpu.core_type<tc>, window_params = [{transform_indices = @transform_0, window_bounds = array<i64: 16, 32>}, {transform_indices = @transform_1, window_bounds = array<i64: 16, 128>}, {pipeline_mode = #tpu.pipeline_mode<synchronous>, transform_indices = @transform_2, window_bounds = array<i64: 32, 512>}, {pipeline_mode = #tpu.pipeline_mode<synchronous>, transform_indices = @transform_3, window_bounds = array<i64: 1, 512>}, {pipeline_mode = #tpu.pipeline_mode<synchronous>, transform_indices = @transform_4, window_bounds = array<i64: 32, 4>}, {pipeline_mode = #tpu.pipeline_mode<synchronous>, transform_indices = @transform_5, window_bounds = array<i64: 1, 4>}, {pipeline_mode = #tpu.pipeline_mode<synchronous>, transform_indices = @transform_6, window_bounds = array<i64: 128, 4>}, {transform_indices = @transform_7, window_bounds = array<i64: 16, 32>}, {transform_indices = @transform_8, window_bounds = array<i64: 16, 4>}]} {
    %c0 = arith.constant 0 : index
    %c0_0 = arith.constant 0 : index
    %0 = vector.load %arg1[%c0, %c0_0] : memref<16x32xf32, #tpu.memory_space<vmem>>, vector<16x32xf32>
    %c0_1 = arith.constant 0 : index
    %c0_2 = arith.constant 0 : index
    %1 = vector.load %arg2[%c0_1, %c0_2] : memref<16x128xf32, #tpu.memory_space<vmem>>, vector<16x128xf32>
    %c0_3 = arith.constant 0 : index
    %c0_4 = arith.constant 0 : index
    %2 = vector.load %arg3[%c0_3, %c0_4] : memref<32x512xf32, #tpu.memory_space<vmem>>, vector<32x512xf32>
    %cst = arith.constant dense<0.000000e+00> : vector<16x512xf32>
    %3 = tpu.matmul %0, %2, %cst {dimension_numbers = #tpu.dot_dimension_numbers<[1], [0], [0], [1], [0, 0, 1, 1], [], []>} : vector<16x32xf32>, vector<32x512xf32>, vector<16x512xf32> -> vector<16x512xf32>
    %c0_5 = arith.constant 0 : index
    %c0_6 = arith.constant 0 : index
    %4 = vector.load %arg4[%c0_5, %c0_6] : memref<1x512xf32, #tpu.memory_space<vmem>>, vector<1x512xf32>
    %5 = vector.broadcast %4 : vector<1x512xf32> to vector<16x512xf32>
    %6 = arith.addf %3, %5 : vector<16x512xf32>
    %c0_7 = arith.constant 0 : index
    %c0_8 = arith.constant 0 : index
    %7 = vector.load %arg5[%c0_7, %c0_8] : memref<32x4xf32, #tpu.memory_space<vmem>>, vector<32x4xf32>
    %cst_9 = arith.constant dense<0.000000e+00> : vector<16x4xf32>
    %8 = tpu.matmul %0, %7, %cst_9 {dimension_numbers = #tpu.dot_dimension_numbers<[1], [0], [0], [1], [0, 0, 1, 1], [], []>} : vector<16x32xf32>, vector<32x4xf32>, vector<16x4xf32> -> vector<16x4xf32>
    %c0_10 = arith.constant 0 : index
    %c0_11 = arith.constant 0 : index
    %9 = vector.load %arg6[%c0_10, %c0_11] : memref<1x4xf32, #tpu.memory_space<vmem>>, vector<1x4xf32>
    %10 = vector.broadcast %9 : vector<1x4xf32> to vector<16x4xf32>
    %11 = arith.addf %8, %10 : vector<16x4xf32>
    %c0_12 = arith.constant 0 : index
    %c0_13 = arith.constant 0 : index
    %12 = vector.load %arg7[%c0_12, %c0_13] : memref<128x4xf32, #tpu.memory_space<vmem>>, vector<128x4xf32>
    %13 = vector.extract_strided_slice %6 {offsets = [0, 0], sizes = [16, 128], strides = [1, 1]} : vector<16x512xf32> to vector<16x128xf32>
    %14 = arith.mulf %1, %13 : vector<16x128xf32>
    %cst_14 = arith.constant dense<0.000000e+00> : vector<16x4xf32>
    %15 = tpu.matmul %14, %12, %cst_14 {dimension_numbers = #tpu.dot_dimension_numbers<[1], [0], [0], [1], [0, 0, 1, 1], [], []>} : vector<16x128xf32>, vector<128x4xf32>, vector<16x4xf32> -> vector<16x4xf32>
    %16 = vector.extract_strided_slice %11 {offsets = [0, 0], sizes = [16, 1], strides = [1, 1]} : vector<16x4xf32> to vector<16x1xf32>
    %17 = vector.broadcast %16 : vector<16x1xf32> to vector<16x4xf32>
    %18 = arith.addf %15, %17 : vector<16x4xf32>
    %cst_15 = arith.constant dense<0xFF800000> : vector<16xf32>
    %19 = vector.multi_reduction <maximumf>, %18, %cst_15 [1] : vector<16x4xf32> to vector<16xf32>
    %20 = vector.shape_cast %19 : vector<16xf32> to vector<16x1xf32>
    %21 = vector.broadcast %20 : vector<16x1xf32> to vector<16x4xf32>
    %22 = arith.subf %18, %21 : vector<16x4xf32>
    %23 = math.exp %22 : vector<16x4xf32>
    %cst_16 = arith.constant dense<0.000000e+00> : vector<16xf32>
    %24 = vector.multi_reduction <add>, %23, %cst_16 [1] : vector<16x4xf32> to vector<16xf32>
    %25 = vector.shape_cast %24 : vector<16xf32> to vector<16x1xf32>
    %26 = vector.broadcast %25 : vector<16x1xf32> to vector<16x4xf32>
    %27 = arith.divf %23, %26 : vector<16x4xf32>
    %28 = vector.extract_strided_slice %6 {offsets = [0, 128], sizes = [16, 128], strides = [1, 1]} : vector<16x512xf32> to vector<16x128xf32>
    %29 = arith.mulf %1, %28 : vector<16x128xf32>
    %cst_17 = arith.constant dense<0.000000e+00> : vector<16x4xf32>
    %30 = tpu.matmul %29, %12, %cst_17 {dimension_numbers = #tpu.dot_dimension_numbers<[1], [0], [0], [1], [0, 0, 1, 1], [], []>} : vector<16x128xf32>, vector<128x4xf32>, vector<16x4xf32> -> vector<16x4xf32>
    %31 = vector.extract_strided_slice %11 {offsets = [0, 1], sizes = [16, 1], strides = [1, 1]} : vector<16x4xf32> to vector<16x1xf32>
    %32 = vector.broadcast %31 : vector<16x1xf32> to vector<16x4xf32>
    %33 = arith.addf %30, %32 : vector<16x4xf32>
    %cst_18 = arith.constant dense<0xFF800000> : vector<16xf32>
    %34 = vector.multi_reduction <maximumf>, %33, %cst_18 [1] : vector<16x4xf32> to vector<16xf32>
    %35 = vector.shape_cast %34 : vector<16xf32> to vector<16x1xf32>
    %36 = vector.broadcast %35 : vector<16x1xf32> to vector<16x4xf32>
    %37 = arith.subf %33, %36 : vector<16x4xf32>
    %38 = math.exp %37 : vector<16x4xf32>
    %cst_19 = arith.constant dense<0.000000e+00> : vector<16xf32>
    %39 = vector.multi_reduction <add>, %38, %cst_19 [1] : vector<16x4xf32> to vector<16xf32>
    %40 = vector.shape_cast %39 : vector<16xf32> to vector<16x1xf32>
    %41 = vector.broadcast %40 : vector<16x1xf32> to vector<16x4xf32>
    %42 = arith.divf %38, %41 : vector<16x4xf32>
    %43 = arith.maximumf %27, %42 : vector<16x4xf32>
    %44 = vector.extract_strided_slice %6 {offsets = [0, 256], sizes = [16, 128], strides = [1, 1]} : vector<16x512xf32> to vector<16x128xf32>
    %45 = arith.mulf %1, %44 : vector<16x128xf32>
    %cst_20 = arith.constant dense<0.000000e+00> : vector<16x4xf32>
    %46 = tpu.matmul %45, %12, %cst_20 {dimension_numbers = #tpu.dot_dimension_numbers<[1], [0], [0], [1], [0, 0, 1, 1], [], []>} : vector<16x128xf32>, vector<128x4xf32>, vector<16x4xf32> -> vector<16x4xf32>
    %47 = vector.extract_strided_slice %11 {offsets = [0, 2], sizes = [16, 1], strides = [1, 1]} : vector<16x4xf32> to vector<16x1xf32>
    %48 = vector.broadcast %47 : vector<16x1xf32> to vector<16x4xf32>
    %49 = arith.addf %46, %48 : vector<16x4xf32>
    %cst_21 = arith.constant dense<0xFF800000> : vector<16xf32>
    %50 = vector.multi_reduction <maximumf>, %49, %cst_21 [1] : vector<16x4xf32> to vector<16xf32>
    %51 = vector.shape_cast %50 : vector<16xf32> to vector<16x1xf32>
    %52 = vector.broadcast %51 : vector<16x1xf32> to vector<16x4xf32>
    %53 = arith.subf %49, %52 : vector<16x4xf32>
    %54 = math.exp %53 : vector<16x4xf32>
    %cst_22 = arith.constant dense<0.000000e+00> : vector<16xf32>
    %55 = vector.multi_reduction <add>, %54, %cst_22 [1] : vector<16x4xf32> to vector<16xf32>
    %56 = vector.shape_cast %55 : vector<16xf32> to vector<16x1xf32>
    %57 = vector.broadcast %56 : vector<16x1xf32> to vector<16x4xf32>
    %58 = arith.divf %54, %57 : vector<16x4xf32>
    %59 = arith.maximumf %43, %58 : vector<16x4xf32>
    %60 = vector.extract_strided_slice %6 {offsets = [0, 384], sizes = [16, 128], strides = [1, 1]} : vector<16x512xf32> to vector<16x128xf32>
    %61 = arith.mulf %1, %60 : vector<16x128xf32>
    %cst_23 = arith.constant dense<0.000000e+00> : vector<16x4xf32>
    %62 = tpu.matmul %61, %12, %cst_23 {dimension_numbers = #tpu.dot_dimension_numbers<[1], [0], [0], [1], [0, 0, 1, 1], [], []>} : vector<16x128xf32>, vector<128x4xf32>, vector<16x4xf32> -> vector<16x4xf32>
    %63 = vector.extract_strided_slice %11 {offsets = [0, 3], sizes = [16, 1], strides = [1, 1]} : vector<16x4xf32> to vector<16x1xf32>
    %64 = vector.broadcast %63 : vector<16x1xf32> to vector<16x4xf32>
    %65 = arith.addf %62, %64 : vector<16x4xf32>
    %cst_24 = arith.constant dense<0xFF800000> : vector<16xf32>
    %66 = vector.multi_reduction <maximumf>, %65, %cst_24 [1] : vector<16x4xf32> to vector<16xf32>
    %67 = vector.shape_cast %66 : vector<16xf32> to vector<16x1xf32>
    %68 = vector.broadcast %67 : vector<16x1xf32> to vector<16x4xf32>
    %69 = arith.subf %65, %68 : vector<16x4xf32>
    %70 = math.exp %69 : vector<16x4xf32>
    %cst_25 = arith.constant dense<0.000000e+00> : vector<16xf32>
    %71 = vector.multi_reduction <add>, %70, %cst_25 [1] : vector<16x4xf32> to vector<16xf32>
    %72 = vector.shape_cast %71 : vector<16xf32> to vector<16x1xf32>
    %73 = vector.broadcast %72 : vector<16x1xf32> to vector<16x4xf32>
    %74 = arith.divf %70, %73 : vector<16x4xf32>
    %75 = arith.maximumf %59, %74 : vector<16x4xf32>
    %cst_26 = arith.constant 1.000000e+00 : f32
    %76 = vector.broadcast %cst_26 : f32 to vector<16x4xf32>
    %77 = arith.divf %75, %76 : vector<16x4xf32>
    %cst_27 = arith.constant dense<0xFF800000> : vector<16xf32>
    %78 = vector.multi_reduction <maximumf>, %77, %cst_27 [1] : vector<16x4xf32> to vector<16xf32>
    %79 = vector.shape_cast %78 : vector<16xf32> to vector<16x1xf32>
    %80 = vector.broadcast %79 : vector<16x1xf32> to vector<16x4xf32>
    %81 = arith.subf %77, %80 : vector<16x4xf32>
    %82 = math.exp %81 : vector<16x4xf32>
    %cst_28 = arith.constant dense<0.000000e+00> : vector<16xf32>
    %83 = vector.multi_reduction <add>, %82, %cst_28 [1] : vector<16x4xf32> to vector<16xf32>
    %84 = vector.shape_cast %83 : vector<16xf32> to vector<16x1xf32>
    %85 = vector.broadcast %84 : vector<16x1xf32> to vector<16x4xf32>
    %86 = arith.divf %82, %85 : vector<16x4xf32>
    %87 = vector.extract_strided_slice %86 {offsets = [0, 0], sizes = [16, 1], strides = [1, 1]} : vector<16x4xf32> to vector<16x1xf32>
    %88 = vector.extract_strided_slice %1 {offsets = [0, 0], sizes = [16, 32], strides = [1, 1]} : vector<16x128xf32> to vector<16x32xf32>
    %89 = vector.broadcast %87 : vector<16x1xf32> to vector<16x32xf32>
    %90 = arith.mulf %89, %88 : vector<16x32xf32>
    %91 = vector.extract_strided_slice %86 {offsets = [0, 1], sizes = [16, 1], strides = [1, 1]} : vector<16x4xf32> to vector<16x1xf32>
    %92 = vector.extract_strided_slice %1 {offsets = [0, 32], sizes = [16, 32], strides = [1, 1]} : vector<16x128xf32> to vector<16x32xf32>
    %93 = vector.broadcast %91 : vector<16x1xf32> to vector<16x32xf32>
    %94 = arith.mulf %93, %92 : vector<16x32xf32>
    %95 = arith.addf %90, %94 : vector<16x32xf32>
    %96 = vector.extract_strided_slice %86 {offsets = [0, 2], sizes = [16, 1], strides = [1, 1]} : vector<16x4xf32> to vector<16x1xf32>
    %97 = vector.extract_strided_slice %1 {offsets = [0, 64], sizes = [16, 32], strides = [1, 1]} : vector<16x128xf32> to vector<16x32xf32>
    %98 = vector.broadcast %96 : vector<16x1xf32> to vector<16x32xf32>
    %99 = arith.mulf %98, %97 : vector<16x32xf32>
    %100 = arith.addf %95, %99 : vector<16x32xf32>
    %101 = vector.extract_strided_slice %86 {offsets = [0, 3], sizes = [16, 1], strides = [1, 1]} : vector<16x4xf32> to vector<16x1xf32>
    %102 = vector.extract_strided_slice %1 {offsets = [0, 96], sizes = [16, 32], strides = [1, 1]} : vector<16x128xf32> to vector<16x32xf32>
    %103 = vector.broadcast %101 : vector<16x1xf32> to vector<16x32xf32>
    %104 = arith.mulf %103, %102 : vector<16x32xf32>
    %105 = arith.addf %100, %104 : vector<16x32xf32>
    %c0_29 = arith.constant 0 : index
    %c0_30 = arith.constant 0 : index
    %106 = vector.load %arg8[%c0_29, %c0_30] : memref<16x32xf32, #tpu.memory_space<vmem>>, vector<16x32xf32>
    tpu.vector_store %arg8[%c0_29, %c0_30], %105 {strides = array<i32>} : memref<16x32xf32, #tpu.memory_space<vmem>>, vector<16x32xf32>,
    %c0_31 = arith.constant 0 : index
    %c0_32 = arith.constant 0 : index
    %107 = vector.load %arg9[%c0_31, %c0_32] : memref<16x4xf32, #tpu.memory_space<vmem>>, vector<16x4xf32>
    tpu.vector_store %arg9[%c0_31, %c0_32], %86 {strides = array<i32>} : memref<16x4xf32, #tpu.memory_space<vmem>>, vector<16x4xf32>,
    return
  }
  func.func @transform_0(%arg0: i32) -> (i32, i32) {
    %c0_i32 = arith.constant 0 : i32
    %c0_i32_0 = arith.constant 0 : i32
    return %arg0, %c0_i32 : i32, i32
  }
  func.func @transform_1(%arg0: i32) -> (i32, i32) {
    %c0_i32 = arith.constant 0 : i32
    %c0_i32_0 = arith.constant 0 : i32
    return %arg0, %c0_i32 : i32, i32
  }
  func.func @transform_2(%arg0: i32) -> (i32, i32) {
    %c0_i32 = arith.constant 0 : i32
    %c0_i32_0 = arith.constant 0 : i32
    %c0_i32_1 = arith.constant 0 : i32
    return %c0_i32, %c0_i32_0 : i32, i32
  }
  func.func @transform_3(%arg0: i32) -> (i32, i32) {
    %c0_i32 = arith.constant 0 : i32
    %c0_i32_0 = arith.constant 0 : i32
    %c0_i32_1 = arith.constant 0 : i32
    return %c0_i32, %c0_i32_0 : i32, i32
  }
  func.func @transform_4(%arg0: i32) -> (i32, i32) {
    %c0_i32 = arith.constant 0 : i32
    %c0_i32_0 = arith.constant 0 : i32
    %c0_i32_1 = arith.constant 0 : i32
    return %c0_i32, %c0_i32_0 : i32, i32
  }
  func.func @transform_5(%arg0: i32) -> (i32, i32) {
    %c0_i32 = arith.constant 0 : i32
    %c0_i32_0 = arith.constant 0 : i32
    %c0_i32_1 = arith.constant 0 : i32
    return %c0_i32, %c0_i32_0 : i32, i32
  }
  func.func @transform_6(%arg0: i32) -> (i32, i32) {
    %c0_i32 = arith.constant 0 : i32
    %c0_i32_0 = arith.constant 0 : i32
    %c0_i32_1 = arith.constant 0 : i32
    return %c0_i32, %c0_i32_0 : i32, i32
  }
  func.func @transform_7(%arg0: i32) -> (i32, i32) {
    %c0_i32 = arith.constant 0 : i32
    %c0_i32_0 = arith.constant 0 : i32
    return %arg0, %c0_i32 : i32, i32
  }
  func.func @transform_8(%arg0: i32) -> (i32, i32) {
    %c0_i32 = arith.constant 0 : i32
    %c0_i32_0 = arith.constant 0 : i32
    return %arg0, %c0_i32 : i32, i32
  }
}

</mosaic_0001>

<bundles_post_ra>
// kernel: tpu_custom_call.1
= control target key start
LH: loop header
LB: loop body
LE: loop exit
PB: predicated region body
PF: predicated region fallthrough
CT: control target
= control target key end

     0   :  { %v1213_v4 = vmov 0.0   ;;  %vm71_vm0 = vcmask 261120   ;;  %s1643_s0 = inlined_call_operand.vmem [shape: f32[16,32], index: 0, kind: input, shape index: {}]   ;;  %s1644_s1 = inlined_call_operand.vmem [shape: f32[16,128], index: 1, kind: input, shape index: {}]   ;;  %s1645_s2 = inlined_call_operand.vmem [shape: f32[32,512], index: 2, kind: input, shape index: {}]   ;;  %s1646_s3 = inlined_call_operand.vmem [shape: f32[1,512], index: 3, kind: input, shape index: {}]   ;;  %s1647_s4 = inlined_call_operand.vmem [shape: f32[32,4], index: 4, kind: input, shape index: {}]   ;;  %s1648_s5 = inlined_call_operand.vmem [shape: f32[1,4], index: 5, kind: input, shape index: {}]   ;;  %s1649_s6 = inlined_call_operand.vmem [shape: f32[128,4], index: 6, kind: input, shape index: {}]   ;;  %s1650_s7 = inlined_call_operand.hbm [shape: f32[16,32], index: 7, kind: output, shape index: {0}]   ;;  %s1651_s8 = inlined_call_operand.vmem [shape: f32[16,4], index: 8, kind: output, shape index: {1}]  }
   0x1   :  { %v46_v0 = vld [vmem:[%s1645_s2 + $0x68] sm:$0xff]  ;;  %v45_v1 = vld [vmem:[%s1645_s2 + $0x60] sm:$0xff]  ;;  %142 = vmatprep.mubr.f32.mxu0 %v1213_v4  ;;  %219 = vmatprep.mubr.f32.mxu1 %v1213_v4  ;;  %v48_v7 = vld [vmem:[%s1645_s2 + $0x78] sm:$0xff] }
   0x2   :  { %v42_v2 = vld [vmem:[%s1645_s2 + $0x48] sm:$0xff]  ;;  %102 = vmatprep.subr.mxu0 %v46_v0  ;;  %v41_v3 = vld [vmem:[%s1645_s2 + $0x40] sm:$0xff]  ;;  %v47_v8 = vld [vmem:[%s1645_s2 + $0x70] sm:$0xff]  ;;  %179 = vmatprep.subr.mxu1 %v48_v7 }
   0x3   :  { %103 = vmatpush1.msra.mxu0 %v45_v1  ;;  %v38_v5 = vld [vmem:[%s1645_s2 + $0x28] sm:$0xff]  ;;  %v37_v6 = vld [vmem:[%s1645_s2 + $0x20] sm:$0xff]  ;;  %v44_v10 = vld [vmem:[%s1645_s2 + $0x58] sm:$0xff]  ;;  %180 = vmatpush1.msra.mxu1 %v47_v8 }
   0x4   :  { %104 = vmatprep.subr.mxu0 %v42_v2  ;;  %v34_v9 = vld [vmem:[%s1645_s2 + $0x8] sm:$0xff]  ;;  %v43_v11 = vld [vmem:[%s1645_s2 + $0x50] sm:$0xff]  ;;  %v33_v12 = vld [vmem:[%s1645_s2] sm:$0xff]  ;;  %181 = vmatprep.subr.mxu1 %v44_v10 }
   0x5   :  { %105 = vmatpush1.msra.mxu0 %v41_v3  ;;  %v40_v13 = vld [vmem:[%s1645_s2 + $0x38] sm:$0xff]  ;;  %v29_v14 = vld [vmem:[%s1643_s0] sm:$0xff]  ;;  %v39_v15 = vld [vmem:[%s1645_s2 + $0x30] sm:$0xff]  ;;  %182 = vmatpush1.msra.mxu1 %v43_v11 }
   0x6   :  { %106 = vmatprep.subr.mxu0 %v38_v5  ;;  %v36_v16 = vld [vmem:[%s1645_s2 + $0x18] sm:$0xff]  ;;  %183 = vmatprep.subr.mxu1 %v40_v13  ;;  %v35_v17 = vld [vmem:[%s1645_s2 + $0x10] sm:$0xff]  ;;  %v30_v19 = vld [vmem:[%s1643_s0 + $0x8] sm:$0xff] }
   0x7   :  { %107 = vmatpush1.msra.mxu0 %v37_v6  ;;  %v235_v18 = vld [vmem:[%s1647_s4 + $0x18] sm:$0xff]  ;;  %184 = vmatpush1.msra.mxu1 %v39_v15  ;;  %v234_v20 = vld [vmem:[%s1647_s4 + $0x10] sm:$0xff] }
   0x8   :  { %108 = vmatprep.subr.mxu0 %v34_v9  ;;  %185 = vmatprep.subr.mxu1 %v36_v16  ;;  %v1334_v21 = vld [vmem:[%s1649_s6 + $0x78] sm:$0xff] }
   0x9   :  { %109 = vmatpush1.msra.mxu0 %v33_v12  ;;  %186 = vmatpush1.msra.mxu1 %v35_v17 }
   0xa   :  { %889 = vmatmul.mubr.msk.f32.vlgmr.msra.gmra.mxu0 %vm71_vm0, %v29_v14  ;;  %974 = vmatprep.subr.mxu0 %v235_v18 }
   0xb   :  { %148 = vmatprep.mubr.f32.mxu0 %v1213_v4  ;;  %891 = vmatmul.mubr.msk.f32.vlgmr.msra.gmra.mxu1 %vm71_vm0, %v29_v14 }
   0xc   :  { %975 = vmatpush3.msra.mxu0 %v235_v18 }
   0xd   :  { %14 = vsyncpa [#allocation3], 0  ;;  %225 = vmatprep.mubr.f32.mxu1 %v1213_v4  ;;  %v233_v22 = vld [vmem:[%s1647_s4 + $0x8] sm:$0xff]  ;;  %976 = vmatprep.subr.mxu0 %v234_v20  ;;  %v232_v23 = vld [vmem:[%s1647_s4] sm:$0xff]  ;;  %v1214_v39 = vmov 1   ;;  %v1215_v40 = vmov 0   ;;  %v51_v41 = vlaneseq }
   0xe   :  { %890 = vmatmul.mubr.msk.f32.gmra.mxu0 %vm71_vm0, %v30_v19  ;;  %985 = vmatprep.subr.mxu1 %v1334_v21  ;;  %v1348_v24 = vld [vmem:[%s1649_s6 + $0x70] sm:$0xff]  ;;  %v1356_v25 = vld [vmem:[%s1649_s6 + $0x68] sm:$0xff]  ;;  %v1364_v26 = vld [vmem:[%s1649_s6 + $0x60] sm:$0xff]  ;;  %vm421_vm1 = vcmask 31744   ;;  %s1219_s17 = smov 64   ;;  %s1220_s18 = smov 32  }
   0xf   :  { %982 = vmatprep.mubr.msk.f32.mxu0 %vm71_vm0, %v29_v14  ;;  %977 = vmatpush3.msra.mxu0 %v234_v20  ;;  %v1373_v27 = vld [vmem:[%s1649_s6 + $0x58] sm:$0xff]  ;;  %v1382_v28 = vld [vmem:[%s1649_s6 + $0x50] sm:$0xff]  ;;  %v1391_v29 = vld [vmem:[%s1649_s6 + $0x48] sm:$0xff]  ;;  %v1489_v42 = vshrl.u32 %v51_v41, 7  ;;  %v1217_v20 = vmov 3   ;;  %s1221_s19 = smov [#allocation2]  }
  0x10   :  { %892 = vmatmul.mubr.msk.f32.gmra.mxu1 %vm71_vm0, %v30_v19  ;;  %978 = vmatprep.subr.mxu0 %v233_v22  ;;  %v1400_v30 = vld [vmem:[%s1649_s6 + $0x40] sm:$0xff]  ;;  %v1409_v31 = vld [vmem:[%s1649_s6 + $0x38] sm:$0xff]  ;;  %v1418_v32 = vld [vmem:[%s1649_s6 + $0x30] sm:$0xff]  ;;  %s874_s20 = sshll.u32 %s1221_s19, 4  ;;  %s875_s20 = int_to_ptr.vmem [resolvable:$true] %s874_s20 }
  0x11   :  { %979 = vmatpush3.msra.mxu0 %v233_v22  ;;  %986 = vmatpush3.msra.mxu1 %v1334_v21  ;;  %v1427_v33 = vld [vmem:[%s1649_s6 + $0x28] sm:$0xff]  ;;  %v1436_v34 = vld [vmem:[%s1649_s6 + $0x20] sm:$0xff]  ;;  %v1452_v35 = vld [vmem:[%s1649_s6 + $0x18] sm:$0xff]  ;;  %v53_v43 = vsub.s32 0, %v1489_v42  ;;  %v57_v45 = vsub.s32 1, %v1489_v42  ;;  %v61_v46 = vsub.s32 2, %v1489_v42  ;;  %p1196_p1 = scmp.lt.s32.totalorder %s875_s20, %s875_s20 }
  0x12   :  { %980 = vmatprep.subr.mxu0 %v232_v23  ;;  %987 = vmatprep.subr.mxu1 %v1348_v24  ;;  %v1460_v36 = vld [vmem:[%s1649_s6 + $0x10] sm:$0xff]  ;;  %v1469_v37 = vld [vmem:[%s1649_s6 + $0x8] sm:$0xff]  ;;  %v1478_v38 = vld [vmem:[%s1649_s6] sm:$0xff]  ;;  %v65_v3 = vsub.s32 3, %v1489_v42  ;;  %s1191_s21 = scalar_lea.vmem %s875_s20, 256 }
  0x13   :  { %981 = vmatpush3.msra.mxu0 %v232_v23  ;;  %988 = vmatpush3.msra.mxu1 %v1348_v24  ;;  %v49_v44 = vld [vmem:[%s1646_s3] sm:$0xf]  ;;  %v1508_v57 = vld [vmem:[%s1644_s1 + $0x8] sm:$0xff]  ;;  %p1192_p0 = scmp.ne.s32.totalorder %s875_s20, %s1191_s21  ;;  %p1197_p2 = scmp.lt.s32.totalorder %s1191_s21, %s1191_s21 }
  0x14   :  { %983 = vmatmul.mubr.msk.f32.vlgmr.msra.gmra.mxu0 %vm71_vm0, %v30_v19  ;;  %1020 = vmatprep.subr.mxu0 %v1334_v21  ;;  %v54_v47 = vrot.slane %v49_v44, %v53_v43  ;;  %v58_v48 = vrot.slane %v49_v44, %v57_v45  ;;  %v1500_v49 = vld [vmem:[%s1644_s1] sm:$0xff]  ;;  %v1502_v51 = vrot.slane %v49_v44, %v61_v46  ;;  %v1216_v19 = vmov 2  }
  0x15   :  { %1021 = vmatpush3.msra.mxu0 %v1334_v21  ;;  %989 = vmatprep.subr.mxu1 %v1356_v25  ;;  %v66_v4 = vrot.slane %v49_v44, %v65_v3  ;;  %v893_v12 = vld [vmem:[%s1648_s5] ss:$0 sm:$0xff]  ;;  %p1198_p3 = por %p1197_p2, %p1196_p1 }
  0x16   :  { %1022 = vmatprep.subr.mxu0 %v1348_v24  ;;  %990 = vmatpush3.msra.mxu1 %v1356_v25 }
  0x17   :  { %1023 = vmatpush3.msra.mxu0 %v1348_v24  ;;  %991 = vmatprep.subr.mxu1 %v1364_v26  ;;  %p1199_p4 = pnand %p1198_p3, %p1192_p0 }
  0x18   :  { %1024 = vmatprep.subr.mxu0 %v1356_v25  ;;  %992 = vmatpush3.msra.mxu1 %v1364_v26 }
  0x19   :  { %1025 = vmatpush3.msra.mxu0 %v1356_v25  ;;  %993 = vmatprep.subr.mxu1 %v1373_v27 }
  0x1a   :  { %1026 = vmatprep.subr.mxu0 %v1364_v26  ;;  %994 = vmatpush3.msra.mxu1 %v1373_v27 }
  0x1b   :  { %1027 = vmatpush3.msra.mxu0 %v1364_v26  ;;  %995 = vmatprep.subr.mxu1 %v1382_v28 }
  0x1c   :  { %1028 = vmatprep.subr.mxu0 %v1373_v27  ;;  %996 = vmatpush3.msra.mxu1 %v1382_v28 }
  0x1d   :  { %1029 = vmatpush3.msra.mxu0 %v1373_v27  ;;  %997 = vmatprep.subr.mxu1 %v1391_v29 }
  0x1e   :  { %1030 = vmatprep.subr.mxu0 %v1382_v28  ;;  %998 = vmatpush3.msra.mxu1 %v1391_v29 }
  0x1f   :  { %1031 = vmatpush3.msra.mxu0 %v1382_v28  ;;  %999 = vmatprep.subr.mxu1 %v1400_v30 }
  0x20   :  { %1032 = vmatprep.subr.mxu0 %v1391_v29  ;;  %1000 = vmatpush3.msra.mxu1 %v1400_v30 }
  0x21   :  { %1033 = vmatpush3.msra.mxu0 %v1391_v29  ;;  %1001 = vmatprep.subr.mxu1 %v1409_v31 }
  0x22   :  { %1034 = vmatprep.subr.mxu0 %v1400_v30  ;;  %1002 = vmatpush3.msra.mxu1 %v1409_v31 }
  0x23   :  { %1035 = vmatpush3.msra.mxu0 %v1400_v30  ;;  %1003 = vmatprep.subr.mxu1 %v1418_v32 }
  0x24   :  { %1036 = vmatprep.subr.mxu0 %v1409_v31  ;;  %1004 = vmatpush3.msra.mxu1 %v1418_v32 }
  0x25   :  { %1037 = vmatpush3.msra.mxu0 %v1409_v31  ;;  %1005 = vmatprep.subr.mxu1 %v1427_v33 }
  0x26   :  { %1038 = vmatprep.subr.mxu0 %v1418_v32  ;;  %1006 = vmatpush3.msra.mxu1 %v1427_v33 }
  0x27   :  { %1039 = vmatpush3.msra.mxu0 %v1418_v32  ;;  %1007 = vmatprep.subr.mxu1 %v1436_v34 }
  0x28   :  { %1040 = vmatprep.subr.mxu0 %v1427_v33  ;;  %1008 = vmatpush3.msra.mxu1 %v1436_v34 }
  0x29   :  { %1041 = vmatpush3.msra.mxu0 %v1427_v33  ;;  %1009 = vmatprep.subr.mxu1 %v1452_v35 }
  0x2a   :  { %1042 = vmatprep.subr.mxu0 %v1436_v34  ;;  %1010 = vmatpush3.msra.mxu1 %v1452_v35 }
  0x2b   :  { %1043 = vmatpush3.msra.mxu0 %v1436_v34  ;;  %1011 = vmatprep.subr.mxu1 %v1460_v36 }
  0x2c   :  { %1044 = vmatprep.subr.mxu0 %v1452_v35  ;;  %1012 = vmatpush3.msra.mxu1 %v1460_v36 }
  0x2d   :  { %1045 = vmatpush3.msra.mxu0 %v1452_v35  ;;  %1013 = vmatprep.subr.mxu1 %v1469_v37 }
  0x2e   :  { %1046 = vmatprep.subr.mxu0 %v1460_v36  ;;  %1014 = vmatpush3.msra.mxu1 %v1469_v37 }
  0x2f   :  { %1047 = vmatpush3.msra.mxu0 %v1460_v36  ;;  %1015 = vmatprep.subr.mxu1 %v1478_v38 }
  0x30   :  { %1048 = vmatprep.subr.mxu0 %v1469_v37  ;;  %1016 = vmatpush3.msra.mxu1 %v1478_v38 }
  0x31   :  { %1049 = vmatpush3.msra.mxu0 %v1469_v37  ;;  %1055 = vmatprep.subr.mxu1 %v1334_v21 }
  0x32   :  { %1050 = vmatprep.subr.mxu0 %v1478_v38  ;;  %1137 = vset.pattern.permute.xlu1 %v1214_v39 }
  0x33   :  { %1051 = vmatpush3.msra.mxu0 %v1478_v38  ;;  %1136 = vset.pattern.permute.xlu0 %v1215_v40 }
  0x34   :  { %1090 = vmatprep.subr.mxu0 %v1334_v21 }
  0xca   :  { %v144_v50 = vpop.f32.mrf.mxu0 }
  0xcb   :  { %v145_v52 = vadd.f32 %v144_v50, %v54_v47  ;;  %v221_v56 = vpop.f32.mrf.mxu1 }
  0xcc   :  { %v146_v53 = vpop.f32.mrf.mxu0  ;;  %v222_v59 = vadd.f32 %v221_v56, %v1502_v51 }
  0xcd   :  { %v334_v54 = vmul.f32 %v145_v52, %v1500_v49  ;;  %v147_v55 = vadd.f32 %v146_v53, %v58_v48  ;;  %v223_v5 = vpop.f32.mrf.mxu1 }
  0xce   :  { %v150_v58 = vpop.f32.mrf.mxu0  ;;  %v553_v63 = vmul.f32 %v222_v59, %v1500_v49  ;;  %v224_v6 = vadd.f32 %v223_v5, %v66_v4 }
  0xcf   :  { %v444_v60 = vmul.f32 %v147_v55, %v1500_v49  ;;  %v151_v61 = vadd.f32 %v150_v58, %v54_v47  ;;  %1017 = vmatprep.mubr.f32.mxu1 %v334_v54 }
  0xd0   :  { %v152_v62 = vpop.f32.mrf.mxu0  ;;  %v227_v7 = vpop.f32.mrf.mxu1  ;;  %v662_v9 = vmul.f32 %v224_v6, %v1500_v49 }
  0xd1   :  { %v335_v0 = vmul.f32 %v151_v61, %v1508_v57  ;;  %v153_v1 = vadd.f32 %v152_v62, %v58_v48  ;;  %1052 = vmatprep.mubr.f32.mxu0 %v444_v60  ;;  %v228_v8 = vadd.f32 %v227_v7, %v1502_v51 }
  0xd2   :  { %v229_v10 = vpop.f32.mrf.mxu1 }
  0xd3   :  { %v445_v2 = vmul.f32 %v153_v1, %v1508_v57  ;;  %1018 = vmatmul.mubr.f32.vlgmr.msra.gmra.mxu1 %v335_v0  ;;  %v554_v13 = vmul.f32 %v228_v8, %v1508_v57  ;;  %v230_v14 = vadd.f32 %v229_v10, %v66_v4 }
  0xd4   :  { %1056 = vmatpush3.msra.mxu1 %v1334_v21  ;;  %1087 = vmatprep.mubr.f32.mxu1 %v553_v63  ;;  %v984_v11 = vpop.f32.mrf.mxu0 }
  0xd5   :  { %1057 = vmatprep.subr.mxu1 %v1348_v24  ;;  %1053 = vmatmul.mubr.f32.vlgmr.msra.gmra.mxu0 %v445_v2  ;;  %v315_v15 = vadd.f32 %v984_v11, %v893_v12  ;;  %v663_v17 = vmul.f32 %v230_v14, %v1508_v57 }
  0xd6   :  { %1058 = vmatpush3.msra.mxu1 %v1348_v24  ;;  %1091 = vmatpush3.msra.mxu0 %v1334_v21  ;;  %v309_v16 = vpop.f32.mrf.mxu0 }
  0xd7   :  { %1059 = vmatprep.subr.mxu1 %v1356_v25  ;;  %1092 = vmatprep.subr.mxu0 %v1348_v24  ;;  %v310_v18 = vadd.f32 %v893_v12, %v309_v16 }
  0xd8   :  { %1060 = vmatpush3.msra.mxu1 %v1356_v25  ;;  %1093 = vmatpush3.msra.mxu0 %v1348_v24 }
  0xd9   :  { %1061 = vmatprep.subr.mxu1 %v1364_v26  ;;  %1094 = vmatprep.subr.mxu0 %v1356_v25 }
  0xda   :  { %1062 = vmatpush3.msra.mxu1 %v1364_v26  ;;  %1095 = vmatpush3.msra.mxu0 %v1356_v25 }
  0xdb   :  { %1063 = vmatprep.subr.mxu1 %v1373_v27  ;;  %1096 = vmatprep.subr.mxu0 %v1364_v26 }
  0xdc   :  { %1064 = vmatpush3.msra.mxu1 %v1373_v27  ;;  %1097 = vmatpush3.msra.mxu0 %v1364_v26 }
  0xdd   :  { %1065 = vmatprep.subr.mxu1 %v1382_v28  ;;  %1098 = vmatprep.subr.mxu0 %v1373_v27 }
  0xde   :  { %1066 = vmatpush3.msra.mxu1 %v1382_v28  ;;  %1099 = vmatpush3.msra.mxu0 %v1373_v27 }
  0xdf   :  { %1067 = vmatprep.subr.mxu1 %v1391_v29  ;;  %1100 = vmatprep.subr.mxu0 %v1382_v28 }
  0xe0   :  { %1068 = vmatpush3.msra.mxu1 %v1391_v29  ;;  %1101 = vmatpush3.msra.mxu0 %v1382_v28 }
  0xe1   :  { %1069 = vmatprep.subr.mxu1 %v1400_v30  ;;  %1102 = vmatprep.subr.mxu0 %v1391_v29 }
  0xe2   :  { %1070 = vmatpush3.msra.mxu1 %v1400_v30  ;;  %1103 = vmatpush3.msra.mxu0 %v1391_v29 }
  0xe3   :  { %1071 = vmatprep.subr.mxu1 %v1409_v31  ;;  %1104 = vmatprep.subr.mxu0 %v1400_v30 }
  0xe4   :  { %1072 = vmatpush3.msra.mxu1 %v1409_v31  ;;  %1105 = vmatpush3.msra.mxu0 %v1400_v30 }
  0xe5   :  { %1073 = vmatprep.subr.mxu1 %v1418_v32  ;;  %1106 = vmatprep.subr.mxu0 %v1409_v31 }
  0xe6   :  { %1074 = vmatpush3.msra.mxu1 %v1418_v32  ;;  %1107 = vmatpush3.msra.mxu0 %v1409_v31 }
  0xe7   :  { %1075 = vmatprep.subr.mxu1 %v1427_v33  ;;  %1108 = vmatprep.subr.mxu0 %v1418_v32 }
  0xe8   :  { %1076 = vmatpush3.msra.mxu1 %v1427_v33  ;;  %1109 = vmatpush3.msra.mxu0 %v1418_v32 }
  0xe9   :  { %1077 = vmatprep.subr.mxu1 %v1436_v34  ;;  %1110 = vmatprep.subr.mxu0 %v1427_v33 }
  0xea   :  { %1078 = vmatpush3.msra.mxu1 %v1436_v34  ;;  %1111 = vmatpush3.msra.mxu0 %v1427_v33 }
  0xeb   :  { %1079 = vmatprep.subr.mxu1 %v1452_v35  ;;  %1112 = vmatprep.subr.mxu0 %v1436_v34 }
  0xec   :  { %1080 = vmatpush3.msra.mxu1 %v1452_v35  ;;  %1113 = vmatpush3.msra.mxu0 %v1436_v34 }
  0xed   :  { %1081 = vmatprep.subr.mxu1 %v1460_v36  ;;  %1114 = vmatprep.subr.mxu0 %v1452_v35 }
  0xee   :  { %1082 = vmatpush3.msra.mxu1 %v1460_v36  ;;  %1115 = vmatpush3.msra.mxu0 %v1452_v35 }
  0xef   :  { %1083 = vmatprep.subr.mxu1 %v1469_v37  ;;  %1116 = vmatprep.subr.mxu0 %v1460_v36 }
  0xf0   :  { %1122 = vmatprep.mubr.f32.mxu0 %v662_v9  ;;  %1084 = vmatpush3.msra.mxu1 %v1469_v37 }
  0xf1   :  { %1117 = vmatpush3.msra.mxu0 %v1460_v36  ;;  %1085 = vmatprep.subr.mxu1 %v1478_v38 }
  0xf2   :  { %1118 = vmatprep.subr.mxu0 %v1469_v37  ;;  %1086 = vmatpush3.msra.mxu1 %v1478_v38 }
  0xf3   :  { %1119 = vmatpush3.msra.mxu0 %v1469_v37  ;;  %1088 = vmatmul.mubr.f32.vlgmr.msra.gmra.mxu1 %v554_v13 }
  0xf4   :  { %1120 = vmatprep.subr.mxu0 %v1478_v38  ;;  %451 = vperm.xlu1 %1137, %v315_v15  }
  0xf5   :  { %1121 = vmatpush3.msra.mxu0 %v1478_v38  ;;  %343 = vperm.xlu0 %1136, %v315_v15  }
  0xf6   :  { %1123 = vmatmul.mubr.f32.vlgmr.msra.gmra.mxu0 %v663_v17 }
  0xf8   :  { %1138 = vset.pattern.permute.xlu1 %v1216_v19 }
  0xf9   :  { %560 = vperm.xlu1 %1138, %v315_v15   ;;  %338 = vperm.xlu0 %1136, %v310_v18  }
  0xfd   :  { %1139 = vset.pattern.permute.xlu1 %v1214_v39  ;;  %1140 = vset.pattern.permute.xlu0 %v1216_v19 }
  0xfe   :  { %447 = vperm.xlu1 %1139, %v310_v18   ;;  %556 = vperm.xlu0 %1140, %v310_v18  }
 0x102   :  { %1141 = vset.pattern.permute.xlu1 %v1217_v20  ;;  %1142 = vset.pattern.permute.xlu0 %v1217_v20 }
 0x103   :  { %665 = vperm.xlu1 %1141, %v310_v18   ;;  %669 = vperm.xlu0 %1142, %v315_v15  }
 0x107   :  { %1144 = vset.pattern.permute.xlu1 %v1214_v39  ;;  %1143 = vset.pattern.permute.xlu0 %v1215_v40 }
 0x16f   :  { %v452_v21 = vpop.permute.xlu1 %451 }
 0x170   :  { %v344_v22 = vpop.permute.xlu0 %343 }
 0x174   :  { %v561_v23 = vpop.permute.xlu1 %560  ;;  %v339_v25 = vpop.permute.xlu0 %338 }
 0x179   :  { %v448_v27 = vpop.permute.xlu1 %447  ;;  %v557_v38 = vpop.permute.xlu0 %556 }
 0x17e   :  { %v670_v44 = vpop.permute.xlu0 %669  ;;  %v666_v50 = vpop.permute.xlu1 %665 }
 0x193   :  { %v1019_v24 = vpop.f32.mrf.mxu1 }
 0x194   :  { %v418_v26 = vadd.f32 %v1019_v24, %v344_v22 }
 0x195   :  { %v412_v28 = vpop.f32.mrf.mxu1  ;;  %v1054_v29 = vpop.f32.mrf.mxu0 }
 0x196   :  { %v413_v30 = vadd.f32 %v412_v28, %v339_v25  ;;  %v526_v31 = vadd.f32 %v1054_v29, %v452_v21  ;;  %v425_v32 = vsel %vm421_vm1, %v418_v26, -inf }
 0x197   :  { %v520_v33 = vpop.f32.mrf.mxu0  ;;  %426 = vmax.xlane.f32.xlu0 %v425_v32 }
 0x198   :  { %v521_v34 = vadd.f32 %v520_v33, %v448_v27  ;;  %v422_v35 = vsel %vm421_vm1, %v413_v30, -inf  ;;  %v532_v36 = vsel %vm421_vm1, %v526_v31, -inf }
 0x199   :  { %423 = vmax.xlane.f32.xlu1 %v422_v35 }
 0x19a   :  { %v529_v37 = vsel %vm421_vm1, %v521_v34, -inf }
 0x19b   :  { %533 = vmax.xlane.f32.xlu0 %v532_v36 }
 0x19d   :  { %530 = vmax.xlane.f32.xlu1 %v529_v37 }
 0x1b3   :  { %v1089_v41 = vpop.f32.mrf.mxu1 }
 0x1b4   :  { %v635_v42 = vadd.f32 %v1089_v41, %v561_v23 }
 0x1b5   :  { %v629_v43 = vpop.f32.mrf.mxu1 }
 0x1b6   :  { %v630_v45 = vadd.f32 %v629_v43, %v557_v38  ;;  %v1124_v46 = vpop.f32.mrf.mxu0  ;;  %v641_v47 = vsel %vm421_vm1, %v635_v42, -inf }
 0x1b7   :  { %v744_v48 = vadd.f32 %v1124_v46, %v670_v44  ;;  %642 = vmax.xlane.f32.xlu0 %v641_v47 }
 0x1b8   :  { %v738_v51 = vpop.f32.mrf.mxu0  ;;  %v638_v52 = vsel %vm421_vm1, %v630_v45, -inf }
 0x1b9   :  { %v739_v53 = vadd.f32 %v738_v51, %v666_v50  ;;  %639 = vmax.xlane.f32.xlu1 %v638_v52  ;;  %v750_v54 = vsel %vm421_vm1, %v744_v48, -inf }
 0x1bb   :  { %751 = vmax.xlane.f32.xlu0 %v750_v54  ;;  %v747_v55 = vsel %vm421_vm1, %v739_v53, -inf }
 0x1bd   :  { %748 = vmax.xlane.f32.xlu1 %v747_v55 }
 0x220   :  { %v427_v56 = vpop.xlane.xlu0 %426 }
 0x221   :  { %v429_v58 = vsub.f32 %v418_v26, %v427_v56 }
 0x222   :  { %v424_v59 = vpop.xlane.xlu1 %423 }
 0x223   :  { %v432_v60 = vmul.f32 1.442695, %v429_v58  ;;  %v428_v61 = vsub.f32 %v413_v30, %v424_v59 }
 0x224   :  { %v534_v62 = vpop.xlane.xlu0 %533 }
 0x225   :  { %1151 = vpow2.f32 %v432_v60  ;;  %v430_v63 = vmul.f32 1.442695, %v428_v61  ;;  %v536_v0 = vsub.f32 %v526_v31, %v534_v62 }
 0x226   :  { %v531_v1 = vpop.xlane.xlu1 %530 }
 0x227   :  { %1153 = vpow2.f32 %v430_v63  ;;  %v539_v2 = vmul.f32 1.442695, %v536_v0  ;;  %v535_v3 = vsub.f32 %v521_v34, %v531_v1 }
 0x229   :  { %1155 = vpow2.f32 %v539_v2  ;;  %v537_v4 = vmul.f32 1.442695, %v535_v3 }
 0x22b   :  { %1157 = vpow2.f32 %v537_v4 }
 0x232   :  { %v1152_v5 = vpop.eup %1151 }
 0x233   :  { %v437_v6 = vsel %vm421_vm1, %v1152_v5, 0.0 }
 0x234   :  { %v1601_v7 = vpop.eup %1153  ;;  %438 = vadd.xlane.f32.xlu0 %v437_v6 }
 0x235   :  { %v434_v8 = vsel %vm421_vm1, %v1601_v7, 0.0 }
 0x236   :  { %v1156_v9 = vpop.eup %1155  ;;  %435 = vadd.xlane.f32.xlu1 %v434_v8 }
 0x237   :  { %v544_v10 = vsel %vm421_vm1, %v1156_v9, 0.0 }
 0x238   :  { %v1158_v11 = vpop.eup %1157  ;;  %545 = vadd.xlane.f32.xlu0 %v544_v10 }
 0x239   :  { %v541_v12 = vsel %vm421_vm1, %v1158_v11, 0.0 }
 0x23a   :  { %542 = vadd.xlane.f32.xlu1 %v541_v12 }
 0x240   :  { %v643_v13 = vpop.xlane.xlu0 %642 }
 0x241   :  { %v645_v14 = vsub.f32 %v635_v42, %v643_v13 }
 0x242   :  { %v640_v15 = vpop.xlane.xlu1 %639 }
 0x243   :  { %v648_v16 = vmul.f32 1.442695, %v645_v14  ;;  %v644_v17 = vsub.f32 %v630_v45, %v640_v15 }
 0x244   :  { %v752_v18 = vpop.xlane.xlu0 %751 }
 0x245   :  { %1159 = vpow2.f32 %v648_v16  ;;  %v646_v21 = vmul.f32 1.442695, %v644_v17  ;;  %v754_v22 = vsub.f32 %v744_v48, %v752_v18 }
 0x246   :  { %v749_v23 = vpop.xlane.xlu1 %748 }
 0x247   :  { %1161 = vpow2.f32 %v646_v21  ;;  %v757_v24 = vmul.f32 1.442695, %v754_v22  ;;  %v753_v25 = vsub.f32 %v739_v53, %v749_v23 }
 0x249   :  { %1163 = vpow2.f32 %v757_v24  ;;  %v755_v26 = vmul.f32 1.442695, %v753_v25 }
 0x24b   :  { %1165 = vpow2.f32 %v755_v26 }
 0x252   :  { %v1160_v27 = vpop.eup %1159 }
 0x253   :  { %v653_v28 = vsel %vm421_vm1, %v1160_v27, 0.0 }
 0x254   :  { %v1162_v29 = vpop.eup %1161  ;;  %654 = vadd.xlane.f32.xlu0 %v653_v28 }
 0x255   :  { %v650_v30 = vsel %vm421_vm1, %v1162_v29, 0.0 }
 0x256   :  { %v1164_v31 = vpop.eup %1163  ;;  %651 = vadd.xlane.f32.xlu1 %v650_v30 }
 0x257   :  { %v762_v32 = vsel %vm421_vm1, %v1164_v31, 0.0 }
 0x258   :  { %v1166_v33 = vpop.eup %1165  ;;  %763 = vadd.xlane.f32.xlu0 %v762_v32 }
 0x259   :  { %v759_v34 = vsel %vm421_vm1, %v1166_v33, 0.0 }
 0x25a   :  { %760 = vadd.xlane.f32.xlu1 %v759_v34 }
 0x2bd   :  { %v439_v35 = vpop.xlane.xlu0 %438 }
 0x2bf   :  { %v436_v36 = vpop.xlane.xlu1 %435 }
 0x2c1   :  { %v546_v37 = vpop.xlane.xlu0 %545 }
 0x2c2   :  { %1167 = vrcp.f32 %v546_v37 }
 0x2c3   :  { %v543_v38 = vpop.xlane.xlu1 %542  ;;  %1169 = vrcp.f32 %v439_v35 }
 0x2c4   :  { %1171 = vrcp.f32 %v543_v38 }
 0x2c5   :  { %1173 = vrcp.f32 %v436_v36 }
 0x2cf   :  { %v1168_v45 = vpop.eup %1167 }
 0x2d0   :  { %v1170_v46 = vpop.eup %1169  ;;  %v550_v50 = vmul.f32 %v1168_v45, %v1156_v9 }
 0x2d1   :  { %v1172_v47 = vpop.eup %1171  ;;  %v443_v52 = vmul.f32 %v1170_v46, %v1152_v5 }
 0x2d2   :  { %v1174_v48 = vpop.eup %1173  ;;  %v548_v54 = vmul.f32 %v1172_v47, %v1158_v11 }
 0x2d3   :  { %v552_v56 = vmax.f32 %v443_v52, %v550_v50  ;;  %v441_v58 = vmul.f32 %v1174_v48, %v1601_v7 }
 0x2d5   :  { %v551_v63 = vmax.f32 %v441_v58, %v548_v54 }
 0x2dd   :  { %v655_v41 = vpop.xlane.xlu0 %654 }
 0x2de   :  { %1175 = vrcp.f32 %v655_v41 }
 0x2df   :  { %v652_v42 = vpop.xlane.xlu1 %651 }
 0x2e0   :  { %1177 = vrcp.f32 %v652_v42 }
 0x2e1   :  { %v764_v43 = vpop.xlane.xlu0 %763 }
 0x2e2   :  { %1179 = vrcp.f32 %v764_v43 }
 0x2e3   :  { %v761_v44 = vpop.xlane.xlu1 %760 }
 0x2e4   :  { %1181 = vrcp.f32 %v761_v44 }
 0x2eb   :  { %v1176_v51 = vpop.eup %1175 }
 0x2ec   :  { %v659_v53 = vmul.f32 %v1176_v51, %v1160_v27 }
 0x2ed   :  { %v1178_v55 = vpop.eup %1177 }
 0x2ee   :  { %v657_v59 = vmul.f32 %v1178_v55, %v1162_v29  ;;  %v661_v61 = vmax.f32 %v552_v56, %v659_v53 }
 0x2ef   :  { %v1180_v60 = vpop.eup %1179 }
 0x2f0   :  { %v768_v62 = vmul.f32 %v1180_v60, %v1164_v31  ;;  %v660_v2 = vmax.f32 %v551_v63, %v657_v59 }
 0x2f1   :  { %v1182_v0 = vpop.eup %1181 }
 0x2f2   :  { %v770_v1 = vmax.f32 %v661_v61, %v768_v62  ;;  %v766_v3 = vmul.f32 %v1182_v0, %v1166_v33 }
 0x2f4   :  { %v774_v4 = vsel %vm421_vm1, %v770_v1, -inf  ;;  %v769_v6 = vmax.f32 %v660_v2, %v766_v3 }
 0x2f5   :  { %775 = vmax.xlane.f32.xlu0 %v774_v4 }
 0x2f6   :  { %v771_v5 = vsel %vm421_vm1, %v769_v6, -inf }
 0x2f7   :  { %772 = vmax.xlane.f32.xlu1 %v771_v5 }
 0x37e   :  { %v776_v8 = vpop.xlane.xlu0 %775 }
 0x37f   :  { %v778_v9 = vsub.f32 %v770_v1, %v776_v8 }
 0x380   :  { %v773_v10 = vpop.xlane.xlu1 %772 }
 0x381   :  { %v781_v7 = vmul.f32 1.442695, %v778_v9  ;;  %v777_v11 = vsub.f32 %v769_v6, %v773_v10 }
 0x383   :  { %1183 = vpow2.f32 %v781_v7  ;;  %v779_v12 = vmul.f32 1.442695, %v777_v11 }
 0x385   :  { %1185 = vpow2.f32 %v779_v12 }
 0x390   :  { %v1184_v13 = vpop.eup %1183 }
 0x391   :  { %v786_v14 = vsel %vm421_vm1, %v1184_v13, 0.0 }
 0x392   :  { %v1186_v15 = vpop.eup %1185  ;;  %787 = vadd.xlane.f32.xlu0 %v786_v14 }
 0x393   :  { %v783_v16 = vsel %vm421_vm1, %v1186_v15, 0.0 }
 0x394   :  { %784 = vadd.xlane.f32.xlu1 %v783_v16 }
 0x41b   :  { %v788_v17 = vpop.xlane.xlu0 %787 }
 0x41c   :  { %1187 = vrcp.f32 %v788_v17 }
 0x41d   :  { %v785_v18 = vpop.xlane.xlu1 %784 }
 0x41e   :  { %1189 = vrcp.f32 %v785_v18 }
 0x429   :  { %v1188_v21 = vpop.eup %1187 }
 0x42a   :  { %v792_v22 = vmul.f32 %v1188_v21, %v1184_v13 }
 0x42b   :  { %v1190_v23 = vpop.eup %1189 }
 0x42c   :  { %800 = vperm.xlu0 %1143, %v792_v22   ;;  %868 = vst.msk [vmem:[%s1651_s8 + $0x8] sm:$0xff] %vm421_vm1, %v792_v22  ;;  %810 = vperm.xlu1 %1144, %v792_v22   ;;  %v790_v24 = vmul.f32 %v1190_v23, %v1186_v15 }
 0x42e   :  { %867 = vst.msk [vmem:[%s1651_s8] sm:$0xff] %vm421_vm1, %v790_v24  ;;  %s1218_s8 = smov 96  }
 0x430   :  { %1145 = vset.pattern.permute.xlu1 %v1216_v19  ;;  %1150 = vset.pattern.permute.xlu0 %v1217_v20 }
 0x431   :  { %830 = vperm.xlu1 %1145, %v792_v22  }
 0x435   :  { %1146 = vset.pattern.permute.xlu1 %v1215_v40 }
 0x436   :  { %795 = vperm.xlu1 %1146, %v790_v24  }
 0x43a   :  { %1147 = vset.pattern.permute.xlu1 %v1214_v39 }
 0x43b   :  { %806 = vperm.xlu1 %1147, %v790_v24  }
 0x43f   :  { %1148 = vset.pattern.permute.xlu1 %v1216_v19 }
 0x440   :  { %826 = vperm.xlu1 %1148, %v790_v24  }
 0x444   :  { %1149 = vset.pattern.permute.xlu1 %v1217_v20 }
 0x445   :  { %846 = vperm.xlu1 %1149, %v790_v24  }
 0x449   :  { %850 = vperm.xlu1 %1149, %v792_v22  }
 0x4a7   :  { %v811_v25 = vpop.permute.xlu1 %810  ;;  %v801_v36 = vpop.permute.xlu0 %800 }
 0x4a8   :  { %v814_v26 = vmul.f32 %v811_v25, %v1508_v57  ;;  %v804_v43 = vmul.f32 %v801_v36, %v1508_v57 }
 0x4aa   :  { %819 = vrot.lane.b32.xlu1 %v814_v26, %s1218_s8 }
 0x4ac   :  { %v831_v27 = vpop.permute.xlu1 %830 }
 0x4ad   :  { %v834_v28 = vmul.f32 %v831_v27, %v1508_v57 }
 0x4af   :  { %839 = vrot.lane.b32.xlu1 %v834_v28, %s1219_s17 }
 0x4b1   :  { %v796_v40 = vpop.permute.xlu1 %795 }
 0x4b2   :  { %v803_v38 = vmul.f32 %v796_v40, %v1500_v49 }
 0x4b6   :  { %v807_v39 = vpop.permute.xlu1 %806 }
 0x4b7   :  { %v813_v29 = vmul.f32 %v807_v39, %v1500_v49 }
 0x4b9   :  { %817 = vrot.lane.b32.xlu1 %v813_v29, %s1218_s8 }
 0x4bb   :  { %v827_v19 = vpop.permute.xlu1 %826 }
 0x4bc   :  { %v833_v20 = vmul.f32 %v827_v19, %v1500_v49 }
 0x4be   :  { %837 = vrot.lane.b32.xlu0 %v833_v20, %s1219_s17 }
 0x4c0   :  { %v847_v30 = vpop.permute.xlu1 %846 }
 0x4c1   :  { %v853_v31 = vmul.f32 %v847_v30, %v1500_v49 }
 0x4c3   :  { %857 = vrot.lane.b32.xlu0 %v853_v31, %s1220_s18 }
 0x4c4   :  { %v851_v32 = vpop.permute.xlu1 %850 }
 0x4c5   :  { %v854_v33 = vmul.f32 %v851_v32, %v1508_v57 }
 0x4c7   :  { %859 = vrot.lane.b32.xlu1 %v854_v33, %s1220_s18 }
 0x51c   :  { %v820_v34 = vpop.permute.xlu1 %819 }
 0x51d   :  { %v824_v46 = vadd.f32 %v820_v34, %v804_v43 }
 0x521   :  { %v840_v35 = vpop.permute.xlu1 %839 }
 0x522   :  { %v844_v48 = vadd.f32 %v840_v35, %v824_v46 }
 0x52b   :  { %v818_v37 = vpop.permute.xlu1 %817 }
 0x52c   :  { %v823_v42 = vadd.f32 %v818_v37, %v803_v38 }
 0x530   :  { %v838_v41 = vpop.permute.xlu0 %837 }
 0x531   :  { %v843_v44 = vadd.f32 %v838_v41, %v823_v42 }
 0x535   :  { %v858_v45 = vpop.permute.xlu0 %857 }
 0x536   :  { %v863_v47 = vadd.f32 %v858_v45, %v843_v44 }
 0x538   :  { %865 = vst.msk [vmem:[#allocation2] sm:$0xff] %vm71_vm0, %v863_v47 }
 0x539   :  { %v860_v50 = vpop.permute.xlu1 %859 }
 0x53a   :  { %v864_v51 = vadd.f32 %v860_v50, %v844_v48 }
 0x53c   :  { %866 = vst.msk [vmem:[#allocation2 + $0x8] sm:$0xff] %vm71_vm0, %v864_v51 }
 0x53d   :  { %1202 = shalt.err (!%p1199_p4)
}
 0x53e   :  { %s1222_s22 = smov 128   ;;  %s1223_s2 = smov 8  }
 0x53f   :  { %880 = dma.vmem_to_hbm [thread:$0]  %s875_s20, 256, %s1650_s7, [#allocation3], %s1222_s22, %s1222_s22, %s1223_s2  }
 0x540   :  { %1211 = dma.done.wait [#allocation3], 256  }
 0x541   :  { %1212 = vsyncadd [#allocation3], 4294967040 }
 0x542   :  { %888 = vsyncpa [#allocation3], 1 }

</bundles_post_ra>
